<compile_context>
chip_gen: v7x
topology: tpu7x:2x2x1
jax: 0.10.0
libtpu: 0.0.40
codegen_flags: <defaults>
</compile_context>

<pallas_src>
import jax
import jax.numpy as jnp
from jax.experimental import pallas as pl
from jax.experimental.pallas import tpu as pltpu


def vae_kernel(x_ref, eps_ref,
               w1_ref, b1_ref, w2_ref, b2_ref,
               w3m_ref, b3m_ref, w3s_ref, b3s_ref,
               w4_ref, b4_ref, w5_ref, b5_ref, w6_ref, b6_ref,
               out_ref):
    # ---- encoder: Linear(n,h) -> tanh -> Linear(h,h) -> tanh -> split head
    x = x_ref[...]                                                  # (Bt, N)
    h1 = jnp.tanh(jnp.dot(x, w1_ref[...],
                          preferred_element_type=jnp.float32) + b1_ref[...])
    h2 = jnp.tanh(jnp.dot(h1, w2_ref[...],
                          preferred_element_type=jnp.float32) + b2_ref[...])
    # mu / sigma computed with two lane-aligned dots (no lane-offset slicing)
    mu = jnp.dot(h2, w3m_ref[...],
                 preferred_element_type=jnp.float32) + b3m_ref[...]     # (Bt, K)
    sigma = jnp.dot(h2, w3s_ref[...],
                    preferred_element_type=jnp.float32) + b3s_ref[...]  # (Bt, K)
    sigma_ = jnp.exp(0.5 * sigma)                                   # sigma.mul(0.5).exp_()

    # ---- reparameterization, stacked z-major into one 2-D slab -------------
    Z = eps_ref.shape[0]
    Bt = x_ref.shape[0]
    # z2[zi*Bt + b, :] = eps[zi, b, :] * sigma_[b, :] + mu[b, :]
    z2 = jnp.concatenate(
        [eps_ref[zi] * sigma_ + mu for zi in range(Z)], axis=0)     # (Z*Bt, K)

    # ---- decoder as plain 2-D MXU dots --------------------------------------
    d1 = jnp.tanh(jnp.dot(z2, w4_ref[...],
                          preferred_element_type=jnp.float32) + b4_ref[...])  # (Z*Bt, H)
    d2 = jnp.tanh(jnp.dot(d1, w5_ref[...],
                          preferred_element_type=jnp.float32) + b5_ref[...])  # (Z*Bt, H)

    # ---- fold the z-draw mean BEFORE the final affine layer (exact) --------
    acc = d2[0:Bt]
    for zi in range(1, Z):
        acc = acc + d2[zi * Bt:(zi + 1) * Bt]
    d2_mean = acc * (1.0 / Z)                                       # (Bt, H)

    out_ref[...] = jnp.dot(d2_mean, w6_ref[...],
                           preferred_element_type=jnp.float32) + b6_ref[...]  # (Bt, N)


def vae_forward(x, eps, params, *, b_tile=None):
    """x: (B, n) f32, eps: (B, z_draws, k) f32, params: 12 (in,out)-weights/biases."""
    B, N = x.shape
    _, Z, K = eps.shape
    if b_tile is None:
        b_tile = B
    assert B % b_tile == 0, "b_tile must divide batch"
    grid = (B // b_tile,)

    w1, b1, w2, b2, w3, b3, w4, b4, w5, b5, w6, b6 = params
    H = w1.shape[1]

    # Split the 2k encoder head into mu / sigma halves (lane-aligned in-kernel).
    w3_mu, w3_sig = w3[:, :K], w3[:, K:]
    b3_mu, b3_sig = b3[:, :K], b3[:, K:]
    weights = [w1, b1, w2, b2, w3_mu, b3_mu, w3_sig, b3_sig,
               w4, b4, w5, b5, w6, b6]

    # z-major layout so the batch axis is second-to-last and tiles contiguously.
    eps_zbk = jnp.transpose(eps, (1, 0, 2))                         # (Z, B, K)

    weight_specs = [pl.BlockSpec(w.shape, lambda i: (0, 0)) for w in weights]

    flops = (2 * B * (N * H + H * H + H * 2 * K)        # encoder
             + 2 * B * Z * (K * H + H * H)              # decoder (per draw)
             + 2 * B * H * N)                           # final layer (post-mean)
    transcendentals = B * 2 * H + B * K + B * Z * 2 * H
    bytes_accessed = 4 * (int(x.size) + int(eps.size)
                          + sum(int(w.size) for w in weights) + B * N)

    return pl.pallas_call(
        vae_kernel,
        out_shape=jax.ShapeDtypeStruct((B, N), jnp.float32),
        grid=grid,
        in_specs=[pl.BlockSpec((b_tile, N), lambda i: (i, 0)),        # x
                  pl.BlockSpec((Z, b_tile, K), lambda i: (0, i, 0))]  # eps (z-major)
                 + weight_specs,
        out_specs=pl.BlockSpec((b_tile, N), lambda i: (i, 0)),
        compiler_params=pltpu.CompilerParams(
            dimension_semantics=("parallel",)),
        cost_estimate=pl.CostEstimate(flops=flops,
                                      transcendentals=transcendentals,
                                      bytes_accessed=bytes_accessed),
    )(x, eps_zbk, *weights)


def init_params(key, n, h, k):
    """Deterministic synthetic parameters, stored already transposed to
    (in, out); biases kept 2-D (1, out) for clean TPU broadcasting."""
    ks = jax.random.split(key, 12)

    def lin(kw, kb, fan_in, fan_out):
        w = 0.1 * jax.random.normal(kw, (fan_in, fan_out), jnp.float32)
        b = 0.1 * jax.random.normal(kb, (1, fan_out), jnp.float32)
        return w, b

    w1, b1 = lin(ks[0], ks[1], n, h)        # encoder Linear(n, h)
    w2, b2 = lin(ks[2], ks[3], h, h)        # encoder Linear(h, h)
    w3, b3 = lin(ks[4], ks[5], h, 2 * k)    # encoder Linear(h, 2k)
    w4, b4 = lin(ks[6], ks[7], k, h)        # decoder Linear(k, h)
    w5, b5 = lin(ks[8], ks[9], h, h)        # decoder Linear(h, h)
    w6, b6 = lin(ks[10], ks[11], h, n)      # decoder Linear(h, n)
    return [w1, b1, w2, b2, w3, b3, w4, b4, w5, b5, w6, b6]


def reference_forward(x, eps, params):
    """Pure-JAX reference mirroring the PyTorch forward_ semantics."""
    w1, b1, w2, b2, w3, b3, w4, b4, w5, b5, w6, b6 = params
    k = eps.shape[2]
    h1 = jnp.tanh(x @ w1 + b1)
    h2 = jnp.tanh(h1 @ w2 + b2)
    enc = h2 @ w3 + b3
    mu, sigma = enc[:, :k], enc[:, k:]
    sigma_ = jnp.exp(0.5 * sigma)
    z = eps * sigma_[:, None, :] + mu[:, None, :]
    zf = z.reshape(-1, k)
    d1 = jnp.tanh(zf @ w4 + b4)
    d2 = jnp.tanh(d1 @ w5 + b5)
    dec = (d2 @ w6 + b6).reshape(x.shape[0], eps.shape[1], -1)
    return dec.mean(axis=1)


if __name__ == "__main__":
    # Small shapes consistent with the module: input_size=32, hidden=32,
    # repr=16, z_draws=7, batch=8.
    B, N, H, K, Z = 8, 32, 32, 16, 7

    key = jax.random.PRNGKey(0)
    k_x, k_eps, k_p = jax.random.split(key, 3)

    x = jax.random.normal(k_x, (B, N), jnp.float32)
    # torch draws eps ~ N(0,1) (DoubleTensor) then transposes -> (B, Z, K);
    # we generate it directly in (B, Z, K), float32 throughout.
    eps = jax.random.normal(k_eps, (B, Z, K), jnp.float32)
    params = init_params(k_p, N, H, K)

    out = vae_forward(x, eps, params)
    jax.block_until_ready(out)

    ref = reference_forward(x, eps, params)
    assert out.shape == (B, N)
    # mean-before-final-linear changes FP summation order slightly; tolerance
    # kept tight since everything stays f32.
    assert jnp.allclose(out, ref, atol=1e-5, rtol=1e-4), "mismatch vs reference"

    print("KERNEL_OK")
</pallas_src>

<mosaic_0001>
module attributes {stable_mosaic.version = 11 : i64} {
  func.func @vae_kernel(%arg0: i32, %arg1: memref<8x32xf32, #tpu.memory_space<vmem>>, %arg2: memref<7x8x16xf32, #tpu.memory_space<vmem>>, %arg3: memref<32x32xf32, #tpu.memory_space<vmem>>, %arg4: memref<1x32xf32, #tpu.memory_space<vmem>>, %arg5: memref<32x32xf32, #tpu.memory_space<vmem>>, %arg6: memref<1x32xf32, #tpu.memory_space<vmem>>, %arg7: memref<32x16xf32, #tpu.memory_space<vmem>>, %arg8: memref<1x16xf32, #tpu.memory_space<vmem>>, %arg9: memref<32x16xf32, #tpu.memory_space<vmem>>, %arg10: memref<1x16xf32, #tpu.memory_space<vmem>>, %arg11: memref<16x32xf32, #tpu.memory_space<vmem>>, %arg12: memref<1x32xf32, #tpu.memory_space<vmem>>, %arg13: memref<32x32xf32, #tpu.memory_space<vmem>>, %arg14: memref<1x32xf32, #tpu.memory_space<vmem>>, %arg15: memref<32x32xf32, #tpu.memory_space<vmem>>, %arg16: memref<1x32xf32, #tpu.memory_space<vmem>>, %arg17: memref<8x32xf32, #tpu.memory_space<vmem>>) attributes {dimension_semantics = [#tpu.dimension_semantics<parallel>], iteration_bounds = array<i64: 1>, scalar_prefetch = 0 : i64, scratch_operands = 0 : i64, tpu.core_type = #tpu.core_type<tc>, window_params = [{transform_indices = @transform_0, window_bounds = array<i64: 8, 32>}, {transform_indices = @transform_1, window_bounds = array<i64: 7, 8, 16>}, {pipeline_mode = #tpu.pipeline_mode<synchronous>, transform_indices = @transform_2, window_bounds = array<i64: 32, 32>}, {pipeline_mode = #tpu.pipeline_mode<synchronous>, transform_indices = @transform_3, window_bounds = array<i64: 1, 32>}, {pipeline_mode = #tpu.pipeline_mode<synchronous>, transform_indices = @transform_4, window_bounds = array<i64: 32, 32>}, {pipeline_mode = #tpu.pipeline_mode<synchronous>, transform_indices = @transform_5, window_bounds = array<i64: 1, 32>}, {pipeline_mode = #tpu.pipeline_mode<synchronous>, transform_indices = @transform_6, window_bounds = array<i64: 32, 16>}, {pipeline_mode = #tpu.pipeline_mode<synchronous>, transform_indices = @transform_7, window_bounds = array<i64: 1, 16>}, {pipeline_mode = #tpu.pipeline_mode<synchronous>, transform_indices = @transform_8, window_bounds = array<i64: 32, 16>}, {pipeline_mode = #tpu.pipeline_mode<synchronous>, transform_indices = @transform_9, window_bounds = array<i64: 1, 16>}, {pipeline_mode = #tpu.pipeline_mode<synchronous>, transform_indices = @transform_10, window_bounds = array<i64: 16, 32>}, {pipeline_mode = #tpu.pipeline_mode<synchronous>, transform_indices = @transform_11, window_bounds = array<i64: 1, 32>}, {pipeline_mode = #tpu.pipeline_mode<synchronous>, transform_indices = @transform_12, window_bounds = array<i64: 32, 32>}, {pipeline_mode = #tpu.pipeline_mode<synchronous>, transform_indices = @transform_13, window_bounds = array<i64: 1, 32>}, {pipeline_mode = #tpu.pipeline_mode<synchronous>, transform_indices = @transform_14, window_bounds = array<i64: 32, 32>}, {pipeline_mode = #tpu.pipeline_mode<synchronous>, transform_indices = @transform_15, window_bounds = array<i64: 1, 32>}, {transform_indices = @transform_16, window_bounds = array<i64: 8, 32>}]} {
    %c0 = arith.constant 0 : index
    %c0_0 = arith.constant 0 : index
    %0 = vector.load %arg1[%c0, %c0_0] : memref<8x32xf32, #tpu.memory_space<vmem>>, vector<8x32xf32>
    %c0_1 = arith.constant 0 : index
    %c0_2 = arith.constant 0 : index
    %1 = vector.load %arg3[%c0_1, %c0_2] : memref<32x32xf32, #tpu.memory_space<vmem>>, vector<32x32xf32>
    %cst = arith.constant dense<0.000000e+00> : vector<8x32xf32>
    %2 = tpu.matmul %0, %1, %cst {dimension_numbers = #tpu.dot_dimension_numbers<[1], [0], [0], [1], [0, 0, 1, 1], [], []>} : vector<8x32xf32>, vector<32x32xf32>, vector<8x32xf32> -> vector<8x32xf32>
    %c0_3 = arith.constant 0 : index
    %c0_4 = arith.constant 0 : index
    %3 = vector.load %arg4[%c0_3, %c0_4] : memref<1x32xf32, #tpu.memory_space<vmem>>, vector<1x32xf32>
    %4 = vector.broadcast %3 : vector<1x32xf32> to vector<8x32xf32>
    %5 = arith.addf %2, %4 : vector<8x32xf32>
    %6 = math.tanh %5 : vector<8x32xf32>
    %c0_5 = arith.constant 0 : index
    %c0_6 = arith.constant 0 : index
    %7 = vector.load %arg5[%c0_5, %c0_6] : memref<32x32xf32, #tpu.memory_space<vmem>>, vector<32x32xf32>
    %cst_7 = arith.constant dense<0.000000e+00> : vector<8x32xf32>
    %8 = tpu.matmul %6, %7, %cst_7 {dimension_numbers = #tpu.dot_dimension_numbers<[1], [0], [0], [1], [0, 0, 1, 1], [], []>} : vector<8x32xf32>, vector<32x32xf32>, vector<8x32xf32> -> vector<8x32xf32>
    %c0_8 = arith.constant 0 : index
    %c0_9 = arith.constant 0 : index
    %9 = vector.load %arg6[%c0_8, %c0_9] : memref<1x32xf32, #tpu.memory_space<vmem>>, vector<1x32xf32>
    %10 = vector.broadcast %9 : vector<1x32xf32> to vector<8x32xf32>
    %11 = arith.addf %8, %10 : vector<8x32xf32>
    %12 = math.tanh %11 : vector<8x32xf32>
    %c0_10 = arith.constant 0 : index
    %c0_11 = arith.constant 0 : index
    %13 = vector.load %arg7[%c0_10, %c0_11] : memref<32x16xf32, #tpu.memory_space<vmem>>, vector<32x16xf32>
    %cst_12 = arith.constant dense<0.000000e+00> : vector<8x16xf32>
    %14 = tpu.matmul %12, %13, %cst_12 {dimension_numbers = #tpu.dot_dimension_numbers<[1], [0], [0], [1], [0, 0, 1, 1], [], []>} : vector<8x32xf32>, vector<32x16xf32>, vector<8x16xf32> -> vector<8x16xf32>
    %c0_13 = arith.constant 0 : index
    %c0_14 = arith.constant 0 : index
    %15 = vector.load %arg8[%c0_13, %c0_14] : memref<1x16xf32, #tpu.memory_space<vmem>>, vector<1x16xf32>
    %16 = vector.broadcast %15 : vector<1x16xf32> to vector<8x16xf32>
    %17 = arith.addf %14, %16 : vector<8x16xf32>
    %c0_15 = arith.constant 0 : index
    %c0_16 = arith.constant 0 : index
    %18 = vector.load %arg9[%c0_15, %c0_16] : memref<32x16xf32, #tpu.memory_space<vmem>>, vector<32x16xf32>
    %cst_17 = arith.constant dense<0.000000e+00> : vector<8x16xf32>
    %19 = tpu.matmul %12, %18, %cst_17 {dimension_numbers = #tpu.dot_dimension_numbers<[1], [0], [0], [1], [0, 0, 1, 1], [], []>} : vector<8x32xf32>, vector<32x16xf32>, vector<8x16xf32> -> vector<8x16xf32>
    %c0_18 = arith.constant 0 : index
    %c0_19 = arith.constant 0 : index
    %20 = vector.load %arg10[%c0_18, %c0_19] : memref<1x16xf32, #tpu.memory_space<vmem>>, vector<1x16xf32>
    %21 = vector.broadcast %20 : vector<1x16xf32> to vector<8x16xf32>
    %22 = arith.addf %19, %21 : vector<8x16xf32>
    %cst_20 = arith.constant 5.000000e-01 : f32
    %23 = vector.broadcast %cst_20 : f32 to vector<8x16xf32>
    %24 = arith.mulf %23, %22 : vector<8x16xf32>
    %25 = math.exp %24 : vector<8x16xf32>
    %c0_21 = arith.constant 0 : index
    %c0_22 = arith.constant 0 : index
    %c0_23 = arith.constant 0 : index
    %26 = vector.load %arg2[%c0_21, %c0_22, %c0_23] : memref<7x8x16xf32, #tpu.memory_space<vmem>>, vector<1x8x16xf32>
    %27 = vector.shape_cast %26 : vector<1x8x16xf32> to vector<8x16xf32>
    %28 = arith.mulf %27, %25 : vector<8x16xf32>
    %29 = arith.addf %28, %17 : vector<8x16xf32>
    %c1 = arith.constant 1 : index
    %c0_24 = arith.constant 0 : index
    %c0_25 = arith.constant 0 : index
    %30 = vector.load %arg2[%c1, %c0_24, %c0_25] : memref<7x8x16xf32, #tpu.memory_space<vmem>>, vector<1x8x16xf32>
    %31 = vector.shape_cast %30 : vector<1x8x16xf32> to vector<8x16xf32>
    %32 = arith.mulf %31, %25 : vector<8x16xf32>
    %33 = arith.addf %32, %17 : vector<8x16xf32>
    %c2 = arith.constant 2 : index
    %c0_26 = arith.constant 0 : index
    %c0_27 = arith.constant 0 : index
    %34 = vector.load %arg2[%c2, %c0_26, %c0_27] : memref<7x8x16xf32, #tpu.memory_space<vmem>>, vector<1x8x16xf32>
    %35 = vector.shape_cast %34 : vector<1x8x16xf32> to vector<8x16xf32>
    %36 = arith.mulf %35, %25 : vector<8x16xf32>
    %37 = arith.addf %36, %17 : vector<8x16xf32>
    %c3 = arith.constant 3 : index
    %c0_28 = arith.constant 0 : index
    %c0_29 = arith.constant 0 : index
    %38 = vector.load %arg2[%c3, %c0_28, %c0_29] : memref<7x8x16xf32, #tpu.memory_space<vmem>>, vector<1x8x16xf32>
    %39 = vector.shape_cast %38 : vector<1x8x16xf32> to vector<8x16xf32>
    %40 = arith.mulf %39, %25 : vector<8x16xf32>
    %41 = arith.addf %40, %17 : vector<8x16xf32>
    %c4 = arith.constant 4 : index
    %c0_30 = arith.constant 0 : index
    %c0_31 = arith.constant 0 : index
    %42 = vector.load %arg2[%c4, %c0_30, %c0_31] : memref<7x8x16xf32, #tpu.memory_space<vmem>>, vector<1x8x16xf32>
    %43 = vector.shape_cast %42 : vector<1x8x16xf32> to vector<8x16xf32>
    %44 = arith.mulf %43, %25 : vector<8x16xf32>
    %45 = arith.addf %44, %17 : vector<8x16xf32>
    %c5 = arith.constant 5 : index
    %c0_32 = arith.constant 0 : index
    %c0_33 = arith.constant 0 : index
    %46 = vector.load %arg2[%c5, %c0_32, %c0_33] : memref<7x8x16xf32, #tpu.memory_space<vmem>>, vector<1x8x16xf32>
    %47 = vector.shape_cast %46 : vector<1x8x16xf32> to vector<8x16xf32>
    %48 = arith.mulf %47, %25 : vector<8x16xf32>
    %49 = arith.addf %48, %17 : vector<8x16xf32>
    %c6 = arith.constant 6 : index
    %c0_34 = arith.constant 0 : index
    %c0_35 = arith.constant 0 : index
    %50 = vector.load %arg2[%c6, %c0_34, %c0_35] : memref<7x8x16xf32, #tpu.memory_space<vmem>>, vector<1x8x16xf32>
    %51 = vector.shape_cast %50 : vector<1x8x16xf32> to vector<8x16xf32>
    %52 = arith.mulf %51, %25 : vector<8x16xf32>
    %53 = arith.addf %52, %17 : vector<8x16xf32>
    %54 = tpu.concatenate %29, %33, %37, %41, %45, %49, %53 in 0 : vector<8x16xf32>, vector<8x16xf32>, vector<8x16xf32>, vector<8x16xf32>, vector<8x16xf32>, vector<8x16xf32>, vector<8x16xf32> -> vector<56x16xf32>
    %c0_36 = arith.constant 0 : index
    %c0_37 = arith.constant 0 : index
    %55 = vector.load %arg11[%c0_36, %c0_37] : memref<16x32xf32, #tpu.memory_space<vmem>>, vector<16x32xf32>
    %cst_38 = arith.constant dense<0.000000e+00> : vector<56x32xf32>
    %56 = tpu.matmul %54, %55, %cst_38 {dimension_numbers = #tpu.dot_dimension_numbers<[1], [0], [0], [1], [0, 0, 1, 1], [], []>} : vector<56x16xf32>, vector<16x32xf32>, vector<56x32xf32> -> vector<56x32xf32>
    %c0_39 = arith.constant 0 : index
    %c0_40 = arith.constant 0 : index
    %57 = vector.load %arg12[%c0_39, %c0_40] : memref<1x32xf32, #tpu.memory_space<vmem>>, vector<1x32xf32>
    %58 = vector.broadcast %57 : vector<1x32xf32> to vector<56x32xf32>
    %59 = arith.addf %56, %58 : vector<56x32xf32>
    %60 = math.tanh %59 : vector<56x32xf32>
    %c0_41 = arith.constant 0 : index
    %c0_42 = arith.constant 0 : index
    %61 = vector.load %arg13[%c0_41, %c0_42] : memref<32x32xf32, #tpu.memory_space<vmem>>, vector<32x32xf32>
    %cst_43 = arith.constant dense<0.000000e+00> : vector<56x32xf32>
    %62 = tpu.matmul %60, %61, %cst_43 {dimension_numbers = #tpu.dot_dimension_numbers<[1], [0], [0], [1], [0, 0, 1, 1], [], []>} : vector<56x32xf32>, vector<32x32xf32>, vector<56x32xf32> -> vector<56x32xf32>
    %c0_44 = arith.constant 0 : index
    %c0_45 = arith.constant 0 : index
    %63 = vector.load %arg14[%c0_44, %c0_45] : memref<1x32xf32, #tpu.memory_space<vmem>>, vector<1x32xf32>
    %64 = vector.broadcast %63 : vector<1x32xf32> to vector<56x32xf32>
    %65 = arith.addf %62, %64 : vector<56x32xf32>
    %66 = math.tanh %65 : vector<56x32xf32>
    %67 = vector.extract_strided_slice %66 {offsets = [0, 0], sizes = [8, 32], strides = [1, 1]} : vector<56x32xf32> to vector<8x32xf32>
    %68 = vector.extract_strided_slice %66 {offsets = [8, 0], sizes = [8, 32], strides = [1, 1]} : vector<56x32xf32> to vector<8x32xf32>
    %69 = arith.addf %67, %68 : vector<8x32xf32>
    %70 = vector.extract_strided_slice %66 {offsets = [16, 0], sizes = [8, 32], strides = [1, 1]} : vector<56x32xf32> to vector<8x32xf32>
    %71 = arith.addf %69, %70 : vector<8x32xf32>
    %72 = vector.extract_strided_slice %66 {offsets = [24, 0], sizes = [8, 32], strides = [1, 1]} : vector<56x32xf32> to vector<8x32xf32>
    %73 = arith.addf %71, %72 : vector<8x32xf32>
    %74 = vector.extract_strided_slice %66 {offsets = [32, 0], sizes = [8, 32], strides = [1, 1]} : vector<56x32xf32> to vector<8x32xf32>
    %75 = arith.addf %73, %74 : vector<8x32xf32>
    %76 = vector.extract_strided_slice %66 {offsets = [40, 0], sizes = [8, 32], strides = [1, 1]} : vector<56x32xf32> to vector<8x32xf32>
    %77 = arith.addf %75, %76 : vector<8x32xf32>
    %78 = vector.extract_strided_slice %66 {offsets = [48, 0], sizes = [8, 32], strides = [1, 1]} : vector<56x32xf32> to vector<8x32xf32>
    %79 = arith.addf %77, %78 : vector<8x32xf32>
    %cst_46 = arith.constant 0.142857149 : f32
    %80 = vector.broadcast %cst_46 : f32 to vector<8x32xf32>
    %81 = arith.mulf %79, %80 : vector<8x32xf32>
    %c0_47 = arith.constant 0 : index
    %c0_48 = arith.constant 0 : index
    %82 = vector.load %arg15[%c0_47, %c0_48] : memref<32x32xf32, #tpu.memory_space<vmem>>, vector<32x32xf32>
    %cst_49 = arith.constant dense<0.000000e+00> : vector<8x32xf32>
    %83 = tpu.matmul %81, %82, %cst_49 {dimension_numbers = #tpu.dot_dimension_numbers<[1], [0], [0], [1], [0, 0, 1, 1], [], []>} : vector<8x32xf32>, vector<32x32xf32>, vector<8x32xf32> -> vector<8x32xf32>
    %c0_50 = arith.constant 0 : index
    %c0_51 = arith.constant 0 : index
    %84 = vector.load %arg16[%c0_50, %c0_51] : memref<1x32xf32, #tpu.memory_space<vmem>>, vector<1x32xf32>
    %85 = vector.broadcast %84 : vector<1x32xf32> to vector<8x32xf32>
    %86 = arith.addf %83, %85 : vector<8x32xf32>
    %c0_52 = arith.constant 0 : index
    %c0_53 = arith.constant 0 : index
    %87 = vector.load %arg17[%c0_52, %c0_53] : memref<8x32xf32, #tpu.memory_space<vmem>>, vector<8x32xf32>
    tpu.vector_store %arg17[%c0_52, %c0_53], %86 {strides = array<i32>} : memref<8x32xf32, #tpu.memory_space<vmem>>, vector<8x32xf32>,
    return
  }
  func.func @transform_0(%arg0: i32) -> (i32, i32) {
    %c0_i32 = arith.constant 0 : i32
    %c0_i32_0 = arith.constant 0 : i32
    return %arg0, %c0_i32 : i32, i32
  }
  func.func @transform_1(%arg0: i32) -> (i32, i32, i32) {
    %c0_i32 = arith.constant 0 : i32
    %c0_i32_0 = arith.constant 0 : i32
    %c0_i32_1 = arith.constant 0 : i32
    return %c0_i32, %arg0, %c0_i32_0 : i32, i32, i32
  }
  func.func @transform_2(%arg0: i32) -> (i32, i32) {
    %c0_i32 = arith.constant 0 : i32
    %c0_i32_0 = arith.constant 0 : i32
    %c0_i32_1 = arith.constant 0 : i32
    return %c0_i32, %c0_i32_0 : i32, i32
  }
  func.func @transform_3(%arg0: i32) -> (i32, i32) {
    %c0_i32 = arith.constant 0 : i32
    %c0_i32_0 = arith.constant 0 : i32
    %c0_i32_1 = arith.constant 0 : i32
    return %c0_i32, %c0_i32_0 : i32, i32
  }
  func.func @transform_4(%arg0: i32) -> (i32, i32) {
    %c0_i32 = arith.constant 0 : i32
    %c0_i32_0 = arith.constant 0 : i32
    %c0_i32_1 = arith.constant 0 : i32
    return %c0_i32, %c0_i32_0 : i32, i32
  }
  func.func @transform_5(%arg0: i32) -> (i32, i32) {
    %c0_i32 = arith.constant 0 : i32
    %c0_i32_0 = arith.constant 0 : i32
    %c0_i32_1 = arith.constant 0 : i32
    return %c0_i32, %c0_i32_0 : i32, i32
  }
  func.func @transform_6(%arg0: i32) -> (i32, i32) {
    %c0_i32 = arith.constant 0 : i32
    %c0_i32_0 = arith.constant 0 : i32
    %c0_i32_1 = arith.constant 0 : i32
    return %c0_i32, %c0_i32_0 : i32, i32
  }
  func.func @transform_7(%arg0: i32) -> (i32, i32) {
    %c0_i32 = arith.constant 0 : i32
    %c0_i32_0 = arith.constant 0 : i32
    %c0_i32_1 = arith.constant 0 : i32
    return %c0_i32, %c0_i32_0 : i32, i32
  }
  func.func @transform_8(%arg0: i32) -> (i32, i32) {
    %c0_i32 = arith.constant 0 : i32
    %c0_i32_0 = arith.constant 0 : i32
    %c0_i32_1 = arith.constant 0 : i32
    return %c0_i32, %c0_i32_0 : i32, i32
  }
  func.func @transform_9(%arg0: i32) -> (i32, i32) {
    %c0_i32 = arith.constant 0 : i32
    %c0_i32_0 = arith.constant 0 : i32
    %c0_i32_1 = arith.constant 0 : i32
    return %c0_i32, %c0_i32_0 : i32, i32
  }
  func.func @transform_10(%arg0: i32) -> (i32, i32) {
    %c0_i32 = arith.constant 0 : i32
    %c0_i32_0 = arith.constant 0 : i32
    %c0_i32_1 = arith.constant 0 : i32
    return %c0_i32, %c0_i32_0 : i32, i32
  }
  func.func @transform_11(%arg0: i32) -> (i32, i32) {
    %c0_i32 = arith.constant 0 : i32
    %c0_i32_0 = arith.constant 0 : i32
    %c0_i32_1 = arith.constant 0 : i32
    return %c0_i32, %c0_i32_0 : i32, i32
  }
  func.func @transform_12(%arg0: i32) -> (i32, i32) {
    %c0_i32 = arith.constant 0 : i32
    %c0_i32_0 = arith.constant 0 : i32
    %c0_i32_1 = arith.constant 0 : i32
    return %c0_i32, %c0_i32_0 : i32, i32
  }
  func.func @transform_13(%arg0: i32) -> (i32, i32) {
    %c0_i32 = arith.constant 0 : i32
    %c0_i32_0 = arith.constant 0 : i32
    %c0_i32_1 = arith.constant 0 : i32
    return %c0_i32, %c0_i32_0 : i32, i32
  }
  func.func @transform_14(%arg0: i32) -> (i32, i32) {
    %c0_i32 = arith.constant 0 : i32
    %c0_i32_0 = arith.constant 0 : i32
    %c0_i32_1 = arith.constant 0 : i32
    return %c0_i32, %c0_i32_0 : i32, i32
  }
  func.func @transform_15(%arg0: i32) -> (i32, i32) {
    %c0_i32 = arith.constant 0 : i32
    %c0_i32_0 = arith.constant 0 : i32
    %c0_i32_1 = arith.constant 0 : i32
    return %c0_i32, %c0_i32_0 : i32, i32
  }
  func.func @transform_16(%arg0: i32) -> (i32, i32) {
    %c0_i32 = arith.constant 0 : i32
    %c0_i32_0 = arith.constant 0 : i32
    return %arg0, %c0_i32 : i32, i32
  }
}

</mosaic_0001>

<bundles_post_ra>
// kernel: tpu_custom_call.1
= control target key start
LH: loop header
LB: loop body
LE: loop exit
PB: predicated region body
PF: predicated region fallthrough
CT: control target
= control target key end

     0   :  { %s1616_s0 = inlined_call_operand.hbm [shape: f32[8,32], index: 0, kind: input, shape index: {}]   ;;  %s1617_s1 = inlined_call_operand.vmem [shape: f32[7,8,16], index: 1, kind: input, shape index: {}]   ;;  %s1618_s2 = inlined_call_operand.vmem [shape: f32[32,32], index: 2, kind: input, shape index: {}]   ;;  %s1619_s3 = inlined_call_operand.vmem [shape: f32[1,32], index: 3, kind: input, shape index: {}]   ;;  %s1620_s4 = inlined_call_operand.hbm [shape: f32[32,32], index: 4, kind: input, shape index: {}]   ;;  %s1621_s5 = inlined_call_operand.vmem [shape: f32[1,32], index: 5, kind: input, shape index: {}]   ;;  %s1622_s6 = inlined_call_operand.vmem [shape: f32[32,16], index: 6, kind: input, shape index: {}]   ;;  %s1623_s7 = inlined_call_operand.hbm [shape: f32[1,16], index: 7, kind: input, shape index: {}]   ;;  %s1624_s8 = inlined_call_operand.vmem [shape: f32[32,16], index: 8, kind: input, shape index: {}]   ;;  %s1625_s9 = inlined_call_operand.vmem [shape: f32[1,16], index: 9, kind: input, shape index: {}]   ;;  %s1626_s10 = inlined_call_operand.hbm [shape: f32[16,32], index: 10, kind: input, shape index: {}]   ;;  %s1627_s11 = inlined_call_operand.vmem [shape: f32[1,32], index: 11, kind: input, shape index: {}]   ;;  %s1628_s12 = inlined_call_operand.vmem [shape: f32[32,32], index: 12, kind: input, shape index: {}]   ;;  %s1629_s13 = inlined_call_operand.vmem [shape: f32[1,32], index: 13, kind: input, shape index: {}]   ;;  %s1630_s14 = inlined_call_operand.hbm [shape: f32[32,32], index: 14, kind: input, shape index: {}]   ;;  %s1631_s15 = inlined_call_operand.vmem [shape: f32[1,32], index: 15, kind: input, shape index: {}]   ;;  %s1632_s16 = inlined_call_operand.hbm [shape: f32[8,32], index: 16, kind: output, shape index: {}]  }
   0x1   :  { %1635 = sst [smem:[#allocation16_spill]] %s1616_s0 }
   0x2   :  { %1636 = sst [smem:[#allocation17_spill]] %s1632_s16 }
   0x3   :  { %21 = vsyncpa [#allocation3], 0 }
   0x4   :  { %22 = vsyncpa [#allocation6], 0 }
   0x5   :  { %23 = vsyncpa [#allocation9], 0 }
   0x6   :  { %24 = vsyncpa [#allocation4], 0  ;;  %s1281_s21 = smov [#allocation5]   ;;  %s1141_s25 = scalar_lea.hbm %s1620_s4, 512 }
   0x7   :  { %s46_s22 = sshll.u32 %s1281_s21, 4  ;;  %p1142_p0 = scmp.ne.s32.totalorder %s1620_s4, %s1141_s25  ;;  %s47_s22 = int_to_ptr.vmem [resolvable:$true] %s46_s22 }
   0x8   :  { %p1145_p1 = scmp.lt.u32.totalorder %s1141_s25, %s1620_s4 }
   0xa   :  { %p1147_p2 = pnand %p1145_p1, %p1142_p0 }
   0xc   :  { %1150 = shalt.err (!%p1147_p2)
}
   0xd   :  { %s1151_s30 = scalar_lea.vmem %s47_s22, 512  ;;  %p1156_p4 = scmp.lt.s32.totalorder %s47_s22, %s47_s22 }
   0xe   :  { %p1152_p3 = scmp.ne.s32.totalorder %s47_s22, %s1151_s30  ;;  %p1157_p5 = scmp.lt.s32.totalorder %s1151_s30, %s1151_s30 }
  0x10   :  { %p1158_p6 = por %p1157_p5, %p1156_p4 }
  0x12   :  { %p1159_p7 = pnand %p1158_p6, %p1152_p3 }
  0x14   :  { %1162 = shalt.err (!%p1159_p7)
}
  0x15   :  { %s1282_s0 = smov 128   ;;  %s1283_s17 = smov 8  }
  0x16   :  { %52 = dma.hbm_to_vmem [thread:$0]  %s1620_s4, 512, %s47_s22, [#allocation6], %s1282_s0, %s1282_s0, %s1283_s17  }
  0x17   :  { %s1284_s20 = smov [#allocation8]   ;;  %s1285_s23 = smov [#allocation2]  }
  0x18   :  { %s76_s21 = sshll.u32 %s1284_s20, 4  ;;  %s31_s24 = sshll.u32 %s1285_s23, 4  ;;  %s77_s21 = int_to_ptr.vmem [resolvable:$true] %s76_s21  ;;  %s32_s24 = int_to_ptr.vmem [resolvable:$true] %s31_s24 }
  0x19   :  { %s1163_s27 = scalar_lea.hbm %s1626_s10, 256 }
  0x1a   :  { %p1164_p8 = scmp.ne.s32.totalorder %s1626_s10, %s1163_s27  ;;  %p1167_p9 = scmp.lt.u32.totalorder %s1163_s27, %s1626_s10 }
  0x1c   :  { %p1169_p10 = pnand %p1167_p9, %p1164_p8 }
  0x1e   :  { %1172 = shalt.err (!%p1169_p10)
}
  0x1f   :  { %s1173_s4 = scalar_lea.vmem %s77_s21, 256  ;;  %p1178_p12 = scmp.lt.s32.totalorder %s77_s21, %s77_s21 }
  0x20   :  { %p1174_p11 = scmp.ne.s32.totalorder %s77_s21, %s1173_s4  ;;  %p1179_p13 = scmp.lt.s32.totalorder %s1173_s4, %s1173_s4 }
  0x22   :  { %p1180_p0 = por %p1179_p13, %p1178_p12 }
  0x24   :  { %p1181_p1 = pnand %p1180_p0, %p1174_p11 }
  0x26   :  { %1184 = shalt.err (!%p1181_p1)
}
  0x27   :  { %82 = dma.hbm_to_vmem [thread:$0]  %s1626_s10, 256, %s77_s21, [#allocation9], %s1282_s0, %s1282_s0, %s1283_s17  }
  0x28   :  { %s1637_s20 = sld [smem:[#allocation16_spill]] }
  0x2e   :  { %s1185_s23 = scalar_lea.hbm %s1637_s20, 128 }
  0x2f   :  { %p1186_p2 = scmp.ne.s32.totalorder %s1637_s20, %s1185_s23  ;;  %p1189_p3 = scmp.lt.u32.totalorder %s1185_s23, %s1637_s20 }
  0x31   :  { %p1191_p4 = pnand %p1189_p3, %p1186_p2 }
  0x33   :  { %1194 = shalt.err (!%p1191_p4)
}
  0x34   :  { %s1195_s29 = scalar_lea.vmem %s32_s24, 128  ;;  %p1200_p6 = scmp.lt.s32.totalorder %s32_s24, %s32_s24 }
  0x35   :  { %p1196_p5 = scmp.ne.s32.totalorder %s32_s24, %s1195_s29  ;;  %p1201_p7 = scmp.lt.s32.totalorder %s1195_s29, %s1195_s29 }
  0x37   :  { %p1202_p8 = por %p1201_p7, %p1200_p6 }
  0x39   :  { %p1203_p9 = pnand %p1202_p8, %p1196_p5 }
  0x3b   :  { %1206 = shalt.err (!%p1203_p9)
}
  0x3c   :  { %34 = dma.hbm_to_vmem [thread:$0]  %s1637_s20, 128, %s32_s24, [#allocation3]  }
  0x3d   :  { %s1286_s30 = smov [#allocation7]   ;;  %s1287_s22 = smov [#allocation10]  }
  0x3e   :  { %s63_s4 = sshll.u32 %s1286_s30, 4  ;;  %s94_s18 = sshll.u32 %s1287_s22, 4  ;;  %s64_s4 = int_to_ptr.vmem [resolvable:$true] %s63_s4  ;;  %s95_s18 = int_to_ptr.vmem [resolvable:$true] %s94_s18 }
  0x3f   :  { %s1207_s23 = scalar_lea.hbm %s1623_s7, 16 }
  0x40   :  { %p1208_p10 = scmp.ne.s32.totalorder %s1623_s7, %s1207_s23  ;;  %p1211_p11 = scmp.lt.u32.totalorder %s1207_s23, %s1623_s7 }
  0x42   :  { %p1213_p12 = pnand %p1211_p11, %p1208_p10 }
  0x44   :  { %1216 = shalt.err (!%p1213_p12)
}
  0x45   :  { %s1217_s24 = scalar_lea.vmem %s64_s4, 16  ;;  %s1221_s20 = scalar_lea.vmem %s64_s4, 32 }
  0x46   :  { %p1218_p13 = scmp.ne.s32.totalorder %s64_s4, %s1217_s24  ;;  %p1222_p0 = scmp.lt.s32.totalorder %s64_s4, %s64_s4 }
  0x47   :  { %p1223_p1 = scmp.lt.s32.totalorder %s1221_s20, %s1217_s24 }
  0x49   :  { %p1224_p2 = por %p1223_p1, %p1222_p0 }
  0x4b   :  { %p1225_p3 = pnand %p1224_p2, %p1218_p13 }
  0x4d   :  { %1228 = shalt.err (!%p1225_p3)
}
  0x4e   :  { %66 = dma.hbm_to_vmem [thread:$0]  %s1623_s7, 16, %s64_s4, [#allocation6]  }
  0x4f   :  { %s1229_s22 = scalar_lea.hbm %s1630_s14, 512 }
  0x50   :  { %p1230_p4 = scmp.ne.s32.totalorder %s1630_s14, %s1229_s22  ;;  %p1233_p5 = scmp.lt.u32.totalorder %s1229_s22, %s1630_s14 }
  0x52   :  { %p1235_p6 = pnand %p1233_p5, %p1230_p4 }
  0x54   :  { %1238 = shalt.err (!%p1235_p6)
}
  0x55   :  { %s1239_s26 = scalar_lea.vmem %s95_s18, 512  ;;  %p1244_p8 = scmp.lt.s32.totalorder %s95_s18, %s95_s18 }
  0x56   :  { %p1240_p7 = scmp.ne.s32.totalorder %s95_s18, %s1239_s26  ;;  %p1245_p9 = scmp.lt.s32.totalorder %s1239_s26, %s1239_s26 }
  0x58   :  { %p1246_p10 = por %p1245_p9, %p1244_p8 }
  0x5a   :  { %p1247_p11 = pnand %p1246_p10, %p1240_p7 }
  0x5c   :  { %1250 = shalt.err (!%p1247_p11)
}
  0x5d   :  { %100 = dma.hbm_to_vmem [thread:$0]  %s1630_s14, 512, %s95_s18, [#allocation9], %s1282_s0, %s1282_s0, %s1283_s17  }
  0x5e   :  { %1273 = dma.done.wait [#allocation3], 128  }
  0x5f   :  { %1274 = vsyncadd [#allocation3], 4294967168 }
  0x60   :  { %1275 = dma.done.wait [#allocation6], 528  }
  0x61   :  { %1276 = vsyncadd [#allocation6], 4294966768 }
  0x62   :  { %1277 = dma.done.wait [#allocation9], 768  }
  0x63   :  { %1278 = vsyncadd [#allocation9], 4294966528  ;;  %v1288_v0 = vmov 0.0|0.0   ;;  %vm1289_vm0 = vmmov 0   ;;  %v1290_v1 = vmov 0.0   ;;  %v119_v2 = vld [vmem:[%s1618_s2] sm:$0xff] }
  0x64   :  { %1057 = vmatprep.subr.bf16.mxu0 %v1288_v0  ;;  %956 = vmatprep.mubr.msk.f32.mxu0 %vm1289_vm0, %v1290_v1  ;;  %v120_v3 = vld [vmem:[%s1618_s2 + $0x8] sm:$0xff]  ;;  %v121_v4 = vld [vmem:[%s1618_s2 + $0x10] sm:$0xff]  ;;  %v122_v6 = vld [vmem:[%s1618_s2 + $0x18] sm:$0xff]  ;;  %vm130_vm1 = vcmask 261120   ;;  %vm494_vm2 = vcmask 130048  }
  0x65   :  { %1063 = vmatprep.subr.bf16.mxu1 %v1288_v0  ;;  %967 = vmatprep.mubr.msk.f32.mxu1 %vm1289_vm0, %v1290_v1  ;;  %v1058_v5 = vpack.c.bf16 %v120_v3, %v119_v2  ;;  %v1061_v7 = vpack.c.bf16 %v122_v6, %v121_v4  ;;  %v118_v8 = vld [vmem:[#allocation2] sm:$0xff]  ;;  %v205_v9 = vld [vmem:[#allocation5] sm:$0xff]  ;;  %v206_v10 = vld [vmem:[#allocation5 + $0x8] sm:$0xff] }
  0x66   :  { %v207_v11 = vld [vmem:[#allocation5 + $0x10] sm:$0xff]  ;;  %v1064_v12 = vpack.c.bf16 %v206_v10, %v205_v9  ;;  %v208_v13 = vld [vmem:[#allocation5 + $0x18] sm:$0xff]  ;;  %v291_v21 = vld [vmem:[%s1622_s6 + $0x8] sm:$0xff] }
  0x67   :  { %1059 = vmatpush3.bf16.msra.mxu0 %v1058_v5  ;;  %v1067_v14 = vpack.c.bf16 %v208_v13, %v207_v11  ;;  %v871_v15 = vld [vmem:[%s1619_s3] ss:$0 sm:$0xff]  ;;  %v375_v24 = vld [vmem:[%s1624_s8 + $0x8] sm:$0xff]  ;;  %v292_v25 = vld [vmem:[%s1622_s6 + $0x10] sm:$0xff] }
  0x68   :  { %1060 = vmatprep.subr.bf16.mxu0 %v1288_v0  ;;  %1065 = vmatpush3.bf16.msra.mxu1 %v1064_v12  ;;  %v290_v20 = vld [vmem:[%s1622_s6] sm:$0xff]  ;;  %v293_v26 = vld [vmem:[%s1622_s6 + $0x18] sm:$0xff]  ;;  %v376_v28 = vld [vmem:[%s1624_s8 + $0x10] sm:$0xff] }
  0x69   :  { %1066 = vmatprep.subr.bf16.mxu1 %v1288_v0  ;;  %v374_v22 = vld [vmem:[%s1624_s8] sm:$0xff]  ;;  %v1070_v23 = vpack.c.bf16 %v291_v21, %v290_v20  ;;  %v377_v29 = vld [vmem:[%s1624_s8 + $0x18] sm:$0xff]  ;;  %v1073_v30 = vpack.c.bf16 %v293_v26, %v292_v25  ;;  %v485_v37 = vld [vmem:[#allocation8] sm:$0xff] }
  0x6a   :  { %v1076_v27 = vpack.c.bf16 %v375_v24, %v374_v22  ;;  %v1079_v31 = vpack.c.bf16 %v377_v29, %v376_v28  ;;  %v873_v32 = vld [vmem:[%s1621_s5] ss:$0 sm:$0xff]  ;;  %v486_v38 = vld [vmem:[#allocation8 + $0x8] sm:$0xff]  ;;  %v875_v48 = vld [vmem:[#allocation7] ss:$0 sm:$0xff]  ;;  %s1291_s5 = smov [#allocation11]  }
  0x6b   :  { %1062 = vmatpush3.bf16.msra.mxu0 %v1061_v7  ;;  %v1082_v39 = vpack.c.bf16 %v486_v38, %v485_v37  ;;  %v877_v40 = vld [vmem:[%s1625_s9] ss:$0 sm:$0xff]  ;;  %v879_v50 = vld [vmem:[%s1617_s1 + $0x8] sm:$0xff]  ;;  %v880_v51 = vld [vmem:[%s1617_s1 + $0x10] sm:$0xff]  ;;  %s860_s8 = sshll.u32 %s1291_s5, 4  ;;  %s861_s8 = int_to_ptr.vmem [resolvable:$true] %s860_s8 }
  0x6c   :  { %1069 = vmatprep.subr.bf16.mxu0 %v1288_v0  ;;  %1068 = vmatpush3.bf16.msra.mxu1 %v1067_v14  ;;  %v458_v49 = vld [vmem:[%s1617_s1] sm:$0xff]  ;;  %v881_v52 = vld [vmem:[%s1617_s1 + $0x18] sm:$0xff]  ;;  %v883_v54 = vld [vmem:[%s1617_s1 + $0x28] sm:$0xff]  ;;  %s1251_s28 = scalar_lea.vmem %s861_s8, 128  ;;  %p1256_p13 = scmp.lt.s32.totalorder %s861_s8, %s861_s8 }
  0x6d   :  { %1075 = vmatprep.subr.bf16.mxu1 %v1288_v0  ;;  %v882_v53 = vld [vmem:[%s1617_s1 + $0x20] sm:$0xff]  ;;  %v884_v55 = vld [vmem:[%s1617_s1 + $0x30] sm:$0xff]  ;;  %v624_v11 = vld [vmem:[%s1628_s12 + $0x8] sm:$0xff]  ;;  %p1252_p12 = scmp.ne.s32.totalorder %s861_s8, %s1251_s28  ;;  %p1257_p0 = scmp.lt.s32.totalorder %s1251_s28, %s1251_s28 }
  0x6e   :  { %957 = vmatmul.mubr.msk.f32.vlgmr.msra.gmra.mrb[0].mxu0 %vm130_vm1, %v118_v8  ;;  %v623_v10 = vld [vmem:[%s1628_s12] sm:$0xff]  ;;  %v625_v13 = vld [vmem:[%s1628_s12 + $0x10] sm:$0xff]  ;;  %v626_v14 = vld [vmem:[%s1628_s12 + $0x18] sm:$0xff] }
  0x6f   :  { %978 = vmatprep.mubr.msk.f32.mxu0 %vm1289_vm0, %v1290_v1  ;;  %1071 = vmatpush3.bf16.msra.mxu0 %v1070_v23  ;;  %v1085_v12 = vpack.c.bf16 %v624_v11, %v623_v10  ;;  %p1258_p1 = por %p1257_p0, %p1256_p13 }
  0x70   :  { %1072 = vmatprep.subr.bf16.mxu0 %v1288_v0 }
  0x71   :  { %p1259_p2 = pnand %p1258_p1, %p1252_p12 }
  0x73   :  { %1074 = vmatpush3.bf16.msra.mxu0 %v1073_v30 }
  0x74   :  { %1081 = vmatprep.subr.bf16.mxu0 %v1288_v0 }
 0x141   :  { %v200_v16 = vpop.f32.mrb[0].mxu0 }
 0x142   :  { %v201_v17 = vadd.f32 %v871_v15, %v200_v16  ;;  %v958_v18 = vpop.f32.mrb[1].mxu0  ;;  %v1088_v15 = vpack.c.bf16 %v626_v14, %v625_v13  ;;  %v885_v16 = vld [vmem:[%s1627_s11] ss:$0 sm:$0xff] }
 0x144   :  { %1107 = vtanh.f32 %v201_v17 }
 0x14e   :  { %v1108_v19 = vpop.eup %1107 }
 0x14f   :  { %968 = vmatmul.mubr.msk.f32.vlgmr.msra.gmra.mrb[0].mxu1 %vm130_vm1, %v1108_v19 }
 0x150   :  { %989 = vmatprep.mubr.msk.f32.mxu1 %vm1289_vm0, %v1290_v1  ;;  %1077 = vmatpush3.bf16.msra.mxu1 %v1076_v27 }
 0x151   :  { %1078 = vmatprep.subr.bf16.mxu1 %v1288_v0 }
 0x154   :  { %1080 = vmatpush3.bf16.msra.mxu1 %v1079_v31 }
 0x155   :  { %1084 = vmatprep.subr.bf16.mxu1 %v1288_v0 }
 0x222   :  { %v285_v33 = vpop.f32.mrb[0].mxu1 }
 0x223   :  { %v286_v34 = vadd.f32 %v873_v32, %v285_v33  ;;  %v969_v35 = vpop.f32.mrb[1].mxu1 }
 0x225   :  { %1109 = vtanh.f32 %v286_v34 }
 0x22f   :  { %v1110_v36 = vpop.eup %1109 }
 0x230   :  { %979 = vmatmul.mubr.msk.f32.vlgmr.msra.gmra.mrb[2].mxu0 %vm130_vm1, %v1110_v36  ;;  %990 = vmatmul.mubr.msk.f32.vlgmr.msra.gmra.mrb[2].mxu1 %vm130_vm1, %v1110_v36 }
 0x231   :  { %996 = vmatprep.mubr.msk.f32.mxu0 %vm1289_vm0, %v1290_v1  ;;  %1025 = vmatprep.mubr.msk.f32.mxu1 %vm1289_vm0, %v1290_v1 }
 0x232   :  { %1083 = vmatpush3.bf16.msra.mxu0 %v1082_v39  ;;  %1086 = vmatpush3.bf16.msra.mxu1 %v1085_v12 }
 0x233   :  { %1090 = vmatprep.subr.bf16.mxu0 %v1288_v0  ;;  %1087 = vmatprep.subr.bf16.mxu1 %v1288_v0 }
 0x236   :  { %1089 = vmatpush3.bf16.msra.mxu1 %v1088_v15 }
 0x303   :  { %v370_v41 = vpop.f32.mrb[2].mxu0  ;;  %v451_v42 = vpop.f32.mrb[2].mxu1 }
 0x304   :  { %v452_v43 = vadd.f32 %v877_v40, %v451_v42  ;;  %v980_v44 = vpop.f32.mrb[3].mxu0  ;;  %v991_v45 = vpop.f32.mrb[3].mxu1  ;;  %v371_v57 = vadd.f32 %v875_v48, %v370_v41  ;;  %v771_v48 = vld [vmem:[#allocation10 + $0x10] sm:$0xff] }
 0x305   :  { %v769_v45 = vld [vmem:[#allocation10] sm:$0xff] }
 0x306   :  { %v455_v46 = vmul.f32 0.5, %v452_v43 }
 0x308   :  { %v456_v47 = vmul.f32 1.442695, %v455_v46  ;;  %v770_v46 = vld [vmem:[#allocation10 + $0x8] sm:$0xff] }
 0x30a   :  { %1111 = vpow2.f32 %v456_v47  ;;  %v1091_v47 = vpack.c.bf16 %v770_v46, %v769_v45 }
 0x314   :  { %v1112_v56 = vpop.eup %1111 }
 0x315   :  { %v459_v58 = vmul.f32 %v1112_v56, %v458_v49  ;;  %v463_v59 = vmul.f32 %v1112_v56, %v879_v50  ;;  %v467_v60 = vmul.f32 %v1112_v56, %v880_v51  ;;  %v471_v61 = vmul.f32 %v1112_v56, %v881_v52  ;;  %v772_v49 = vld [vmem:[#allocation10 + $0x18] sm:$0xff]  ;;  %v893_v51 = vld [vmem:[%s1629_s13] ss:$0 sm:$0xff] }
 0x316   :  { %v475_v62 = vmul.f32 %v1112_v56, %v882_v53  ;;  %v479_v63 = vmul.f32 %v1112_v56, %v883_v54  ;;  %v483_v2 = vmul.f32 %v1112_v56, %v884_v55  ;;  %v1094_v50 = vpack.c.bf16 %v772_v49, %v771_v48 }
 0x317   :  { %v460_v3 = vadd.f32 %v459_v58, %v371_v57  ;;  %v464_v4 = vadd.f32 %v463_v59, %v371_v57  ;;  %v468_v5 = vadd.f32 %v467_v60, %v371_v57  ;;  %v472_v6 = vadd.f32 %v471_v61, %v371_v57 }
 0x318   :  { %v476_v7 = vadd.f32 %v475_v62, %v371_v57  ;;  %v480_v8 = vadd.f32 %v479_v63, %v371_v57  ;;  %v484_v9 = vadd.f32 %v483_v2, %v371_v57 }
 0x319   :  { %997 = vmatmul.mubr.msk.f32.vlgmr.msra.gmra.mrb[4].mxu0 %vm494_vm2, %v460_v3 }
 0x31a   :  { %999 = vmatprep.mubr.msk.f32.mxu0 %vm1289_vm0, %v1290_v1  ;;  %1092 = vmatpush3.bf16.msra.mxu0 %v1091_v47 }
 0x31b   :  { %1093 = vmatprep.subr.bf16.mxu0 %v1288_v0 }
 0x31d   :  { %1000 = vmatmul.mubr.msk.f32.gmra.mrb[6].mxu0 %vm494_vm2, %v464_v4 }
 0x31e   :  { %1002 = vmatprep.mubr.msk.f32.mxu0 %vm1289_vm0, %v1290_v1  ;;  %1095 = vmatpush3.bf16.msra.mxu0 %v1094_v50 }
 0x321   :  { %1003 = vmatmul.mubr.msk.f32.gmra.mrb[8].mxu0 %vm494_vm2, %v468_v5 }
 0x322   :  { %1005 = vmatprep.mubr.msk.f32.mxu0 %vm1289_vm0, %v1290_v1 }
 0x325   :  { %1006 = vmatmul.mubr.msk.f32.gmra.mrb[10].mxu0 %vm494_vm2, %v472_v6 }
 0x326   :  { %1008 = vmatprep.mubr.msk.f32.mxu0 %vm1289_vm0, %v1290_v1 }
 0x329   :  { %1009 = vmatmul.mubr.msk.f32.gmra.mrb[12].mxu0 %vm494_vm2, %v476_v7 }
 0x32a   :  { %1011 = vmatprep.mubr.msk.f32.mxu0 %vm1289_vm0, %v1290_v1 }
 0x32d   :  { %1012 = vmatmul.mubr.msk.f32.gmra.mrb[14].mxu0 %vm494_vm2, %v480_v8 }
 0x32e   :  { %1014 = vmatprep.mubr.msk.f32.mxu0 %vm1289_vm0, %v1290_v1 }
 0x331   :  { %1015 = vmatmul.mubr.msk.f32.gmra.mrb[16].mxu0 %vm494_vm2, %v484_v9 }
 0x332   :  { %1054 = vmatprep.mubr.msk.f32.mxu0 %vm1289_vm0, %v1290_v1 }
 0x3ec   :  { %v582_v17 = vpop.f32.mrb[4].mxu0 }
 0x3ed   :  { %v583_v18 = vadd.f32 %v885_v16, %v582_v17  ;;  %v998_v19 = vpop.f32.mrb[5].mxu0 }
 0x3ef   :  { %1113 = vtanh.f32 %v583_v18 }
 0x3f0   :  { %v587_v20 = vpop.f32.mrb[6].mxu0 }
 0x3f1   :  { %v588_v21 = vadd.f32 %v885_v16, %v587_v20  ;;  %v1001_v22 = vpop.f32.mrb[7].mxu0 }
 0x3f3   :  { %1115 = vtanh.f32 %v588_v21 }
 0x3f4   :  { %v592_v23 = vpop.f32.mrb[8].mxu0 }
 0x3f5   :  { %v593_v24 = vadd.f32 %v885_v16, %v592_v23  ;;  %v1004_v25 = vpop.f32.mrb[9].mxu0  ;;  %v901_v23 = vld [vmem:[%s1631_s15] ss:$0 sm:$0xff] }
 0x3f7   :  { %1117 = vtanh.f32 %v593_v24 }
 0x3f8   :  { %v597_v26 = vpop.f32.mrb[10].mxu0 }
 0x3f9   :  { %v1114_v27 = vpop.eup %1113  ;;  %v598_v28 = vadd.f32 %v885_v16, %v597_v26  ;;  %v1007_v29 = vpop.f32.mrb[11].mxu0 }
 0x3fa   :  { %1026 = vmatmul.mubr.msk.f32.vlgmr.msra.gmra.mrb[4].mxu1 %vm130_vm1, %v1114_v27 }
 0x3fb   :  { %1119 = vtanh.f32 %v598_v28  ;;  %1028 = vmatprep.mubr.msk.f32.mxu1 %vm1289_vm0, %v1290_v1 }
 0x3fc   :  { %v602_v30 = vpop.f32.mrb[12].mxu0 }
 0x3fd   :  { %v1116_v31 = vpop.eup %1115  ;;  %v603_v32 = vadd.f32 %v885_v16, %v602_v30  ;;  %v1010_v33 = vpop.f32.mrb[13].mxu0 }
 0x3fe   :  { %1029 = vmatmul.mubr.msk.f32.gmra.mrb[6].mxu1 %vm130_vm1, %v1116_v31 }
 0x3ff   :  { %1121 = vtanh.f32 %v603_v32  ;;  %1031 = vmatprep.mubr.msk.f32.mxu1 %vm1289_vm0, %v1290_v1 }
 0x400   :  { %v607_v34 = vpop.f32.mrb[14].mxu0 }
 0x401   :  { %v1118_v35 = vpop.eup %1117  ;;  %v608_v36 = vadd.f32 %v885_v16, %v607_v34  ;;  %v1013_v37 = vpop.f32.mrb[15].mxu0 }
 0x402   :  { %1032 = vmatmul.mubr.msk.f32.gmra.mrb[8].mxu1 %vm130_vm1, %v1118_v35 }
 0x403   :  { %1123 = vtanh.f32 %v608_v36  ;;  %1034 = vmatprep.mubr.msk.f32.mxu1 %vm1289_vm0, %v1290_v1 }
 0x404   :  { %v612_v38 = vpop.f32.mrb[16].mxu0 }
 0x405   :  { %v1120_v39 = vpop.eup %1119  ;;  %v613_v40 = vadd.f32 %v885_v16, %v612_v38  ;;  %v1016_v41 = vpop.f32.mrb[17].mxu0 }
 0x406   :  { %1035 = vmatmul.mubr.msk.f32.gmra.mrb[10].mxu1 %vm130_vm1, %v1120_v39 }
 0x407   :  { %1125 = vtanh.f32 %v613_v40  ;;  %1037 = vmatprep.mubr.msk.f32.mxu1 %vm1289_vm0, %v1290_v1 }
 0x409   :  { %v1122_v42 = vpop.eup %1121 }
 0x40a   :  { %1038 = vmatmul.mubr.msk.f32.gmra.mrb[12].mxu1 %vm130_vm1, %v1122_v42 }
 0x40b   :  { %1040 = vmatprep.mubr.msk.f32.mxu1 %vm1289_vm0, %v1290_v1 }
 0x40d   :  { %v1124_v43 = vpop.eup %1123 }
 0x40e   :  { %1041 = vmatmul.mubr.msk.f32.gmra.mrb[14].mxu1 %vm130_vm1, %v1124_v43 }
 0x40f   :  { %1043 = vmatprep.mubr.msk.f32.mxu1 %vm1289_vm0, %v1290_v1 }
 0x411   :  { %v1126_v44 = vpop.eup %1125 }
 0x412   :  { %1044 = vmatmul.mubr.msk.f32.gmra.mrb[16].mxu1 %vm130_vm1, %v1126_v44 }
 0x4cd   :  { %v721_v52 = vpop.f32.mrb[4].mxu1 }
 0x4ce   :  { %v1027_v53 = vpop.f32.mrb[5].mxu1  ;;  %v722_v1 = vadd.f32 %v893_v51, %v721_v52 }
 0x4d0   :  { %1127 = vtanh.f32 %v722_v1 }
 0x4d1   :  { %v726_v54 = vpop.f32.mrb[6].mxu1 }
 0x4d2   :  { %v727_v55 = vadd.f32 %v893_v51, %v726_v54  ;;  %v1030_v56 = vpop.f32.mrb[7].mxu1 }
 0x4d4   :  { %1129 = vtanh.f32 %v727_v55 }
 0x4d5   :  { %v731_v57 = vpop.f32.mrb[8].mxu1 }
 0x4d6   :  { %v732_v58 = vadd.f32 %v893_v51, %v731_v57  ;;  %v1033_v59 = vpop.f32.mrb[9].mxu1 }
 0x4d8   :  { %1131 = vtanh.f32 %v732_v58 }
 0x4d9   :  { %v736_v0 = vpop.f32.mrb[10].mxu1 }
 0x4da   :  { %v737_v60 = vadd.f32 %v893_v51, %v736_v0  ;;  %v1036_v61 = vpop.f32.mrb[11].mxu1  ;;  %v1128_v62 = vpop.eup %1127 }
 0x4dc   :  { %1133 = vtanh.f32 %v737_v60 }
 0x4dd   :  { %v741_v63 = vpop.f32.mrb[12].mxu1 }
 0x4de   :  { %v1130_v2 = vpop.eup %1129  ;;  %v742_v3 = vadd.f32 %v893_v51, %v741_v63  ;;  %v1039_v4 = vpop.f32.mrb[13].mxu1 }
 0x4df   :  { %v762_v5 = vadd.f32 %v1130_v2, %v1128_v62 }
 0x4e0   :  { %1135 = vtanh.f32 %v742_v3 }
 0x4e1   :  { %v746_v6 = vpop.f32.mrb[14].mxu1 }
 0x4e2   :  { %v1132_v7 = vpop.eup %1131  ;;  %v747_v8 = vadd.f32 %v893_v51, %v746_v6  ;;  %v1042_v9 = vpop.f32.mrb[15].mxu1 }
 0x4e3   :  { %v763_v10 = vadd.f32 %v1132_v7, %v762_v5 }
 0x4e4   :  { %1137 = vtanh.f32 %v747_v8 }
 0x4e5   :  { %v751_v11 = vpop.f32.mrb[16].mxu1 }
 0x4e6   :  { %v1134_v12 = vpop.eup %1133  ;;  %v752_v13 = vadd.f32 %v893_v51, %v751_v11  ;;  %v1045_v14 = vpop.f32.mrb[17].mxu1 }
 0x4e7   :  { %v764_v15 = vadd.f32 %v1134_v12, %v763_v10 }
 0x4e8   :  { %1139 = vtanh.f32 %v752_v13 }
 0x4ea   :  { %v1136_v16 = vpop.eup %1135 }
 0x4eb   :  { %v765_v17 = vadd.f32 %v1136_v16, %v764_v15 }
 0x4ee   :  { %v1138_v18 = vpop.eup %1137 }
 0x4ef   :  { %v766_v19 = vadd.f32 %v1138_v18, %v765_v17 }
 0x4f2   :  { %v1140_v20 = vpop.eup %1139 }
 0x4f3   :  { %v767_v21 = vadd.f32 %v1140_v20, %v766_v19 }
 0x4f5   :  { %v768_v22 = vmul.f32 0.14285715, %v767_v21 }
 0x4f7   :  { %1055 = vmatmul.mubr.msk.f32.vlgmr.msra.gmra.mrb[18].mxu0 %vm130_vm1, %v768_v22 }
 0x5ca   :  { %v849_v24 = vpop.f32.mrb[18].mxu0 }
 0x5cb   :  { %v850_v25 = vadd.f32 %v901_v23, %v849_v24  ;;  %v1056_v26 = vpop.f32.mrb[19].mxu0 }
 0x5cd   :  { %853 = vst.msk [vmem:[#allocation11] sm:$0xff] %vm130_vm1, %v850_v25 }
 0x5ce   :  { %1262 = shalt.err (!%p1259_p2)
}
 0x5cf   :  { %s1638_s2 = sld [smem:[#allocation17_spill]] }
 0x5d5   :  { %s1263_s29 = scalar_lea.hbm %s1638_s2, 128 }
 0x5d6   :  { %p1264_p3 = scmp.ne.s32.totalorder %s1638_s2, %s1263_s29  ;;  %p1267_p4 = scmp.lt.u32.totalorder %s1263_s29, %s1638_s2 }
 0x5d8   :  { %p1269_p5 = pnand %p1267_p4, %p1264_p3 }
 0x5da   :  { %1272 = shalt.err (!%p1269_p5)
}
 0x5db   :  { %863 = dma.vmem_to_hbm [thread:$0]  %s861_s8, 128, %s1638_s2, [#allocation4]  }
 0x5dc   :  { %1279 = dma.done.wait [#allocation4], 128  }
 0x5dd   :  { %1280 = vsyncadd [#allocation4], 4294967168 }
 0x5de   :  { %867 = vsyncpa [#allocation3], 1 }
 0x5df   :  { %868 = vsyncpa [#allocation6], 1 }
 0x5e0   :  { %869 = vsyncpa [#allocation9], 1 }
 0x5e1   :  { %870 = vsyncpa [#allocation4], 1 }

</bundles_post_ra>
